<compile_context>
chip_gen: v6e
topology: v6e:2x2x1
jax: 0.10.0
libtpu: 0.0.40
codegen_flags: <defaults>
</compile_context>

<pallas_src>
import functools
import math

import jax
import jax.numpy as jnp
from jax.experimental import pallas as pl
from jax.experimental.pallas import tpu as pltpu


def _round_up(x, m):
    return (x + m - 1) // m * m


def _cdiv(a, b):
    return (a + b - 1) // b


def _mha_map_kernel(q_ref, kp_ref, wqt_ref, bq_ref, out_ref, *,
                    num_heads, head_dim, hw, hw_pad):
    # q_ref   : (TQ, D)         f32  query tile
    # kp_ref  : (HID, HW_pad)   bf16 pre-projected feature map (lane-dense on HW)
    # wqt_ref : (D, HID)        f32  Wq^T * norm   (norm folded in wrapper)
    # bq_ref  : (1, HID)        f32  bq   * norm
    # out_ref : (TQ, NH*HW_pad) f32  softmaxed attention map; also serves as the
    #                                only score-sized buffer (written in place).
    tq = q_ref.shape[0]

    # Query projection (MXU, f32 accumulation); cast to bf16 for score matmuls.
    qp = jnp.dot(q_ref[...], wqt_ref[...],
                 preferred_element_type=jnp.float32) + bq_ref[...]      # (TQ, HID)
    qp = qp.astype(jnp.bfloat16)

    # Pass 1 (flash-style): per-head scores -> unnormalized probs straight into
    # out_ref; running max m / rescaled sum-exp l; per-head max snapshots.
    m = jnp.full((tq, 1), -jnp.inf, jnp.float32)
    l = jnp.zeros((tq, 1), jnp.float32)
    m_snap = []
    for n in range(num_heads):
        qh = qp[:, n * head_dim:(n + 1) * head_dim]                     # (TQ, hd)  bf16
        kh = kp_ref[n * head_dim:(n + 1) * head_dim, :]                 # (hd, HW_pad) bf16
        s_n = jnp.dot(qh, kh, preferred_element_type=jnp.float32)       # (TQ, HW_pad) f32
        if hw_pad != hw:
            # Exclude padded columns from the joint softmax.
            col = jax.lax.broadcasted_iota(jnp.int32, s_n.shape, 1)
            s_n = jnp.where(col < hw, s_n, -jnp.inf)
        m_new = jnp.maximum(m, jnp.max(s_n, axis=-1, keepdims=True))
        p_n = jnp.exp(s_n - m_new)                                      # padded cols -> 0
        out_ref[:, n * hw_pad:(n + 1) * hw_pad] = p_n
        l = l * jnp.exp(m - m_new) + jnp.sum(p_n, axis=-1, keepdims=True)
        m = m_new
        m_snap.append(m_new)

    # Pass 2: in-place rescale; only (TQ,1)-sized exps here — the full-size exp
    # was done exactly once above.  Exact reciprocal: rows sum to 1.
    inv_l = pl.reciprocal(l, approx=False)
    for n in range(num_heads):
        scale = jnp.exp(m_snap[n] - m) * inv_l                          # (TQ, 1)
        sl = slice(n * hw_pad, (n + 1) * hw_pad)
        out_ref[:, sl] = out_ref[:, sl] * scale
    # TODO(synk): optional `mask` argument (masked_fill with -inf *before* the
    # running max/sum-exp update) not wired in; forward is exercised with mask=None.


def mh_attention_map(q, k, wq, bq, wk, bk, num_heads, *, q_tile=None):
    """q: [B, Q, D] f32, k: [B, D, H, W] f32 (NCHW). Returns [B, Q, NH, H, W] f32."""
    B, Q, D = q.shape
    _, C, H, W = k.shape
    assert C == D
    HID = wq.shape[0]
    head_dim = HID // num_heads
    HW = H * W
    HW_pad = _round_up(HW, 128)              # lane-aligned per-head slices / stores
    norm_fact = float(HID / num_heads) ** (-0.5)

    # ---- one-time wrapper-side (XLA) work -------------------------------------
    # Fold the softmax normalisation into the q-projection parameters.
    wq_t = jnp.transpose(wq) * norm_fact                                 # (D, HID)
    bq2 = (bq * norm_fact).reshape(1, HID)
    # Hoist the 1x1-conv k projection out of the kernel: identical for every
    # query tile of a batch.  Lane-dense on HW, bf16 operand for the MXU.
    k_flat = k.reshape(B, C, HW)                                         # zero-copy
    kp = jnp.einsum('od,bdx->box', wk, k_flat) + bk[None, :, None]       # (B, HID, HW)
    if HW_pad != HW:
        kp = jnp.pad(kp, ((0, 0), (0, 0), (0, HW_pad - HW)))
    kp = kp.astype(jnp.bfloat16)

    # ---- query tiling: 8-aligned tiles, padded Q, >= 2 grid steps --------------
    if q_tile is None:
        q_tile = min(128, _round_up(Q, 8))
    q_tile = _round_up(q_tile, 8)
    # >= 2 total grid steps so the output writeback pipelines behind the next
    # step's compute and a v7x second TensorCore has work even at B == 1.
    while B * _cdiv(Q, q_tile) < 2 and q_tile > 8:
        q_tile = _round_up(_cdiv(q_tile, 2), 8)
    Q_pad = _round_up(Q, q_tile)
    if Q_pad != Q:
        q = jnp.pad(q, ((0, 0), (0, Q_pad - Q), (0, 0)))

    # ---- per-generation VMEM budget --------------------------------------------
    try:    # ~96 MiB on v5e/v6e (128 MiB physical), ~48 MiB on v7x (64 MiB).
        vmem_cap = pltpu.get_tpu_info().vmem_capacity_bytes
    except Exception:
        vmem_cap = 64 * 1024 * 1024
    vmem_limit = int(min(96 * 1024 * 1024, vmem_cap * 3 // 4))

    kernel = functools.partial(
        _mha_map_kernel, num_heads=num_heads, head_dim=head_dim,
        hw=HW, hw_pad=HW_pad)

    out_flat = pl.pallas_call(
        kernel,
        out_shape=jax.ShapeDtypeStruct((B, Q_pad, num_heads * HW_pad), jnp.float32),
        grid=(B, Q_pad // q_tile),
        in_specs=[
            pl.BlockSpec((None, q_tile, D), lambda b, qi: (b, qi, 0)),    # queries
            pl.BlockSpec((None, HID, HW_pad), lambda b, qi: (b, 0, 0)),   # kp (bf16)
            pl.BlockSpec((D, HID), lambda b, qi: (0, 0)),                 # Wq^T * norm
            pl.BlockSpec((1, HID), lambda b, qi: (0, 0)),                 # bq   * norm
        ],
        out_specs=pl.BlockSpec((None, q_tile, num_heads * HW_pad),
                               lambda b, qi: (b, qi, 0)),
        compiler_params=pltpu.CompilerParams(
            dimension_semantics=("parallel", "parallel"),
            vmem_limit_bytes=vmem_limit),
    )(q, kp, wq_t, bq2)

    # flat index within a head = h*W + w (matches torch .flatten(2)); drop padding.
    out = out_flat[:, :Q, :].reshape(B, Q, num_heads, HW_pad)
    if HW_pad != HW:
        out = out[:, :, :, :HW]
    return out.reshape(B, Q, num_heads, H, W)


def _reference(q, k, wq, bq, wk, bk, num_heads):
    """Pure-JAX reference matching the PyTorch forward (mask=None, dropout=0)."""
    B, Q, D = q.shape
    _, C, H, W = k.shape
    HID = wq.shape[0]
    hd = HID // num_heads
    norm = float(HID / num_heads) ** (-0.5)
    qp = q @ wq.T + bq                                                   # [B, Q, HID]
    kp = jnp.einsum('bchw,oc->bohw', k, wk) + bk[None, :, None, None]    # [B, HID, H, W]
    qh = qp.reshape(B, Q, num_heads, hd)
    kh = kp.reshape(B, num_heads, hd, H, W)
    w = jnp.einsum('bqnc,bnchw->bqnhw', qh * norm, kh)
    wf = w.reshape(B, Q, -1)
    wf = jax.nn.softmax(wf, axis=-1)
    return wf.reshape(B, Q, num_heads, H, W)


def _run_case(seed, B, Q, D, H, W, HID, NH):
    key = jax.random.PRNGKey(seed)
    kq, kk, kwq, kwk = jax.random.split(key, 4)
    q = jax.random.normal(kq, (B, Q, D), dtype=jnp.float32)
    k = jax.random.normal(kk, (B, D, H, W), dtype=jnp.float32)
    # xavier_uniform_ on weights [hidden, query_dim], zeros on biases.
    bound = math.sqrt(6.0 / (D + HID))
    wq = jax.random.uniform(kwq, (HID, D), jnp.float32, -bound, bound)
    wk = jax.random.uniform(kwk, (HID, D), jnp.float32, -bound, bound)
    bq = jnp.zeros((HID,), jnp.float32)
    bk = jnp.zeros((HID,), jnp.float32)

    out = mh_attention_map(q, k, wq, bq, wk, bk, NH)
    out = jax.block_until_ready(out)
    ref = _reference(q, k, wq, bq, wk, bk, NH)
    assert out.shape == (B, Q, NH, H, W)
    # Tolerance: bf16 operands on the score matmuls (f32 accumulation, exact
    # softmax reciprocal) — measured error is orders of magnitude below this.
    assert jnp.allclose(out, ref, atol=2e-4, rtol=2e-3), \
        f"case seed={seed}: max abs diff {jnp.max(jnp.abs(out - ref))}"


if __name__ == "__main__":
    # Case 1: small, DETR-consistent, fully aligned shapes (HW = 256, Q = 8).
    _run_case(seed=0, B=2, Q=8, D=4, H=16, W=16, HID=32, NH=4)
    # Case 2: misaligned shapes exercising HW padding (100 -> 128), Q padding
    # (10 -> 16) and the >=2-grid-step split at B == 1.
    _run_case(seed=1, B=1, Q=10, D=4, H=10, W=10, HID=32, NH=4)
    print("KERNEL_OK")
</pallas_src>

<mosaic_0001>
module attributes {stable_mosaic.version = 11 : i64} {
  func.func @_mha_map_kernel(%arg0: i32, %arg1: i32, %arg2: memref<1x8x4xf32, #tpu.memory_space<vmem>>, %arg3: memref<1x32x256xbf16, #tpu.memory_space<vmem>>, %arg4: memref<4x32xf32, #tpu.memory_space<vmem>>, %arg5: memref<1x32xf32, #tpu.memory_space<vmem>>, %arg6: memref<1x8x1024xf32, #tpu.memory_space<vmem>>) attributes {dimension_semantics = [#tpu.dimension_semantics<parallel>, #tpu.dimension_semantics<parallel>], iteration_bounds = array<i64: 2, 1>, scalar_prefetch = 0 : i64, scratch_operands = 0 : i64, tpu.core_type = #tpu.core_type<tc>, window_params = [{transform_indices = @transform_0, window_bounds = array<i64: 1, 8, 4>}, {transform_indices = @transform_1, window_bounds = array<i64: 1, 32, 256>}, {pipeline_mode = #tpu.pipeline_mode<synchronous>, transform_indices = @transform_2, window_bounds = array<i64: 4, 32>}, {pipeline_mode = #tpu.pipeline_mode<synchronous>, transform_indices = @transform_3, window_bounds = array<i64: 1, 32>}, {transform_indices = @transform_4, window_bounds = array<i64: 1, 8, 1024>}]} {
    %c0 = arith.constant 0 : index
    %c0_0 = arith.constant 0 : index
    %c0_1 = arith.constant 0 : index
    %0 = vector.load %arg2[%c0, %c0_0, %c0_1] : memref<1x8x4xf32, #tpu.memory_space<vmem>>, vector<1x8x4xf32>
    %1 = vector.shape_cast %0 : vector<1x8x4xf32> to vector<8x4xf32>
    %c0_2 = arith.constant 0 : index
    %c0_3 = arith.constant 0 : index
    %2 = vector.load %arg4[%c0_2, %c0_3] : memref<4x32xf32, #tpu.memory_space<vmem>>, vector<4x32xf32>
    %cst = arith.constant dense<0.000000e+00> : vector<8x32xf32>
    %3 = tpu.matmul %1, %2, %cst {dimension_numbers = #tpu.dot_dimension_numbers<[1], [0], [0], [1], [0, 0, 1, 1], [], []>} : vector<8x4xf32>, vector<4x32xf32>, vector<8x32xf32> -> vector<8x32xf32>
    %c0_4 = arith.constant 0 : index
    %c0_5 = arith.constant 0 : index
    %4 = vector.load %arg5[%c0_4, %c0_5] : memref<1x32xf32, #tpu.memory_space<vmem>>, vector<1x32xf32>
    %5 = vector.broadcast %4 : vector<1x32xf32> to vector<8x32xf32>
    %6 = arith.addf %3, %5 : vector<8x32xf32>
    %7 = arith.truncf %6 : vector<8x32xf32> to vector<8x32xbf16>
    %cst_6 = arith.constant 0xFF800000 : f32
    %8 = vector.broadcast %cst_6 : f32 to vector<8x1xf32>
    %cst_7 = arith.constant 0.000000e+00 : f32
    %9 = vector.broadcast %cst_7 : f32 to vector<8x1xf32>
    %10 = vector.extract_strided_slice %7 {offsets = [0, 0], sizes = [8, 8], strides = [1, 1]} : vector<8x32xbf16> to vector<8x8xbf16>
    %c0_8 = arith.constant 0 : index
    %c0_9 = arith.constant 0 : index
    %c0_10 = arith.constant 0 : index
    %11 = vector.load %arg3[%c0_8, %c0_9, %c0_10] : memref<1x32x256xbf16, #tpu.memory_space<vmem>>, vector<1x8x256xbf16>
    %12 = vector.shape_cast %11 : vector<1x8x256xbf16> to vector<8x256xbf16>
    %cst_11 = arith.constant dense<0.000000e+00> : vector<8x256xf32>
    %13 = tpu.matmul %10, %12, %cst_11 {dimension_numbers = #tpu.dot_dimension_numbers<[1], [0], [0], [1], [0, 0, 1, 1], [], []>} : vector<8x8xbf16>, vector<8x256xbf16>, vector<8x256xf32> -> vector<8x256xf32>
    %cst_12 = arith.constant dense<0xFF800000> : vector<8xf32>
    %14 = vector.multi_reduction <maximumf>, %13, %cst_12 [1] : vector<8x256xf32> to vector<8xf32>
    %15 = vector.shape_cast %14 : vector<8xf32> to vector<8x1xf32>
    %16 = arith.maximumf %8, %15 : vector<8x1xf32>
    %17 = vector.broadcast %16 : vector<8x1xf32> to vector<8x256xf32>
    %18 = arith.subf %13, %17 : vector<8x256xf32>
    %19 = math.exp %18 : vector<8x256xf32>
    %c0_13 = arith.constant 0 : index
    %c0_14 = arith.constant 0 : index
    %c0_15 = arith.constant 0 : index
    %20 = vector.load %arg6[%c0_13, %c0_14, %c0_15] : memref<1x8x1024xf32, #tpu.memory_space<vmem>>, vector<1x8x256xf32>
    %21 = vector.shape_cast %20 : vector<1x8x256xf32> to vector<8x256xf32>
    %22 = vector.shape_cast %19 : vector<8x256xf32> to vector<1x8x256xf32>
    tpu.vector_store %arg6[%c0_13, %c0_14, %c0_15], %22 {strides = array<i32>} : memref<1x8x1024xf32, #tpu.memory_space<vmem>>, vector<1x8x256xf32>,
    %23 = arith.subf %8, %16 : vector<8x1xf32>
    %24 = math.exp %23 : vector<8x1xf32>
    %25 = arith.mulf %9, %24 : vector<8x1xf32>
    %cst_16 = arith.constant dense<0.000000e+00> : vector<8xf32>
    %26 = vector.multi_reduction <add>, %19, %cst_16 [1] : vector<8x256xf32> to vector<8xf32>
    %27 = vector.shape_cast %26 : vector<8xf32> to vector<8x1xf32>
    %28 = arith.addf %25, %27 : vector<8x1xf32>
    %29 = vector.extract_strided_slice %7 {offsets = [0, 8], sizes = [8, 8], strides = [1, 1]} : vector<8x32xbf16> to vector<8x8xbf16>
    %c0_17 = arith.constant 0 : index
    %c8 = arith.constant 8 : index
    %c0_18 = arith.constant 0 : index
    %30 = vector.load %arg3[%c0_17, %c8, %c0_18] : memref<1x32x256xbf16, #tpu.memory_space<vmem>>, vector<1x8x256xbf16>
    %31 = vector.shape_cast %30 : vector<1x8x256xbf16> to vector<8x256xbf16>
    %cst_19 = arith.constant dense<0.000000e+00> : vector<8x256xf32>
    %32 = tpu.matmul %29, %31, %cst_19 {dimension_numbers = #tpu.dot_dimension_numbers<[1], [0], [0], [1], [0, 0, 1, 1], [], []>} : vector<8x8xbf16>, vector<8x256xbf16>, vector<8x256xf32> -> vector<8x256xf32>
    %cst_20 = arith.constant dense<0xFF800000> : vector<8xf32>
    %33 = vector.multi_reduction <maximumf>, %32, %cst_20 [1] : vector<8x256xf32> to vector<8xf32>
    %34 = vector.shape_cast %33 : vector<8xf32> to vector<8x1xf32>
    %35 = arith.maximumf %16, %34 : vector<8x1xf32>
    %36 = vector.broadcast %35 : vector<8x1xf32> to vector<8x256xf32>
    %37 = arith.subf %32, %36 : vector<8x256xf32>
    %38 = math.exp %37 : vector<8x256xf32>
    %c0_21 = arith.constant 0 : index
    %c0_22 = arith.constant 0 : index
    %c256 = arith.constant 256 : index
    %39 = vector.load %arg6[%c0_21, %c0_22, %c256] : memref<1x8x1024xf32, #tpu.memory_space<vmem>>, vector<1x8x256xf32>
    %40 = vector.shape_cast %39 : vector<1x8x256xf32> to vector<8x256xf32>
    %41 = vector.shape_cast %38 : vector<8x256xf32> to vector<1x8x256xf32>
    tpu.vector_store %arg6[%c0_21, %c0_22, %c256], %41 {strides = array<i32>} : memref<1x8x1024xf32, #tpu.memory_space<vmem>>, vector<1x8x256xf32>,
    %42 = arith.subf %16, %35 : vector<8x1xf32>
    %43 = math.exp %42 : vector<8x1xf32>
    %44 = arith.mulf %28, %43 : vector<8x1xf32>
    %cst_23 = arith.constant dense<0.000000e+00> : vector<8xf32>
    %45 = vector.multi_reduction <add>, %38, %cst_23 [1] : vector<8x256xf32> to vector<8xf32>
    %46 = vector.shape_cast %45 : vector<8xf32> to vector<8x1xf32>
    %47 = arith.addf %44, %46 : vector<8x1xf32>
    %48 = vector.extract_strided_slice %7 {offsets = [0, 16], sizes = [8, 8], strides = [1, 1]} : vector<8x32xbf16> to vector<8x8xbf16>
    %c0_24 = arith.constant 0 : index
    %c16 = arith.constant 16 : index
    %c0_25 = arith.constant 0 : index
    %49 = vector.load %arg3[%c0_24, %c16, %c0_25] : memref<1x32x256xbf16, #tpu.memory_space<vmem>>, vector<1x8x256xbf16>
    %50 = vector.shape_cast %49 : vector<1x8x256xbf16> to vector<8x256xbf16>
    %cst_26 = arith.constant dense<0.000000e+00> : vector<8x256xf32>
    %51 = tpu.matmul %48, %50, %cst_26 {dimension_numbers = #tpu.dot_dimension_numbers<[1], [0], [0], [1], [0, 0, 1, 1], [], []>} : vector<8x8xbf16>, vector<8x256xbf16>, vector<8x256xf32> -> vector<8x256xf32>
    %cst_27 = arith.constant dense<0xFF800000> : vector<8xf32>
    %52 = vector.multi_reduction <maximumf>, %51, %cst_27 [1] : vector<8x256xf32> to vector<8xf32>
    %53 = vector.shape_cast %52 : vector<8xf32> to vector<8x1xf32>
    %54 = arith.maximumf %35, %53 : vector<8x1xf32>
    %55 = vector.broadcast %54 : vector<8x1xf32> to vector<8x256xf32>
    %56 = arith.subf %51, %55 : vector<8x256xf32>
    %57 = math.exp %56 : vector<8x256xf32>
    %c0_28 = arith.constant 0 : index
    %c0_29 = arith.constant 0 : index
    %c512 = arith.constant 512 : index
    %58 = vector.load %arg6[%c0_28, %c0_29, %c512] : memref<1x8x1024xf32, #tpu.memory_space<vmem>>, vector<1x8x256xf32>
    %59 = vector.shape_cast %58 : vector<1x8x256xf32> to vector<8x256xf32>
    %60 = vector.shape_cast %57 : vector<8x256xf32> to vector<1x8x256xf32>
    tpu.vector_store %arg6[%c0_28, %c0_29, %c512], %60 {strides = array<i32>} : memref<1x8x1024xf32, #tpu.memory_space<vmem>>, vector<1x8x256xf32>,
    %61 = arith.subf %35, %54 : vector<8x1xf32>
    %62 = math.exp %61 : vector<8x1xf32>
    %63 = arith.mulf %47, %62 : vector<8x1xf32>
    %cst_30 = arith.constant dense<0.000000e+00> : vector<8xf32>
    %64 = vector.multi_reduction <add>, %57, %cst_30 [1] : vector<8x256xf32> to vector<8xf32>
    %65 = vector.shape_cast %64 : vector<8xf32> to vector<8x1xf32>
    %66 = arith.addf %63, %65 : vector<8x1xf32>
    %67 = vector.extract_strided_slice %7 {offsets = [0, 24], sizes = [8, 8], strides = [1, 1]} : vector<8x32xbf16> to vector<8x8xbf16>
    %c0_31 = arith.constant 0 : index
    %c24 = arith.constant 24 : index
    %c0_32 = arith.constant 0 : index
    %68 = vector.load %arg3[%c0_31, %c24, %c0_32] : memref<1x32x256xbf16, #tpu.memory_space<vmem>>, vector<1x8x256xbf16>
    %69 = vector.shape_cast %68 : vector<1x8x256xbf16> to vector<8x256xbf16>
    %cst_33 = arith.constant dense<0.000000e+00> : vector<8x256xf32>
    %70 = tpu.matmul %67, %69, %cst_33 {dimension_numbers = #tpu.dot_dimension_numbers<[1], [0], [0], [1], [0, 0, 1, 1], [], []>} : vector<8x8xbf16>, vector<8x256xbf16>, vector<8x256xf32> -> vector<8x256xf32>
    %cst_34 = arith.constant dense<0xFF800000> : vector<8xf32>
    %71 = vector.multi_reduction <maximumf>, %70, %cst_34 [1] : vector<8x256xf32> to vector<8xf32>
    %72 = vector.shape_cast %71 : vector<8xf32> to vector<8x1xf32>
    %73 = arith.maximumf %54, %72 : vector<8x1xf32>
    %74 = vector.broadcast %73 : vector<8x1xf32> to vector<8x256xf32>
    %75 = arith.subf %70, %74 : vector<8x256xf32>
    %76 = math.exp %75 : vector<8x256xf32>
    %c0_35 = arith.constant 0 : index
    %c0_36 = arith.constant 0 : index
    %c768 = arith.constant 768 : index
    %77 = vector.load %arg6[%c0_35, %c0_36, %c768] : memref<1x8x1024xf32, #tpu.memory_space<vmem>>, vector<1x8x256xf32>
    %78 = vector.shape_cast %77 : vector<1x8x256xf32> to vector<8x256xf32>
    %79 = vector.shape_cast %76 : vector<8x256xf32> to vector<1x8x256xf32>
    tpu.vector_store %arg6[%c0_35, %c0_36, %c768], %79 {strides = array<i32>} : memref<1x8x1024xf32, #tpu.memory_space<vmem>>, vector<1x8x256xf32>,
    %80 = arith.subf %54, %73 : vector<8x1xf32>
    %81 = math.exp %80 : vector<8x1xf32>
    %82 = arith.mulf %66, %81 : vector<8x1xf32>
    %cst_37 = arith.constant dense<0.000000e+00> : vector<8xf32>
    %83 = vector.multi_reduction <add>, %76, %cst_37 [1] : vector<8x256xf32> to vector<8xf32>
    %84 = vector.shape_cast %83 : vector<8xf32> to vector<8x1xf32>
    %85 = arith.addf %82, %84 : vector<8x1xf32>
    %86 = tpu.reciprocal %85 : vector<8x1xf32> -> vector<8x1xf32>
    %87 = arith.subf %16, %73 : vector<8x1xf32>
    %88 = math.exp %87 : vector<8x1xf32>
    %89 = arith.mulf %88, %86 : vector<8x1xf32>
    %c0_38 = arith.constant 0 : index
    %c0_39 = arith.constant 0 : index
    %c0_40 = arith.constant 0 : index
    %90 = vector.load %arg6[%c0_38, %c0_39, %c0_40] : memref<1x8x1024xf32, #tpu.memory_space<vmem>>, vector<1x8x256xf32>
    %91 = vector.shape_cast %90 : vector<1x8x256xf32> to vector<8x256xf32>
    %92 = vector.broadcast %89 : vector<8x1xf32> to vector<8x256xf32>
    %93 = arith.mulf %91, %92 : vector<8x256xf32>
    %c0_41 = arith.constant 0 : index
    %c0_42 = arith.constant 0 : index
    %c0_43 = arith.constant 0 : index
    %94 = vector.load %arg6[%c0_41, %c0_42, %c0_43] : memref<1x8x1024xf32, #tpu.memory_space<vmem>>, vector<1x8x256xf32>
    %95 = vector.shape_cast %94 : vector<1x8x256xf32> to vector<8x256xf32>
    %96 = vector.shape_cast %93 : vector<8x256xf32> to vector<1x8x256xf32>
    tpu.vector_store %arg6[%c0_41, %c0_42, %c0_43], %96 {strides = array<i32>} : memref<1x8x1024xf32, #tpu.memory_space<vmem>>, vector<1x8x256xf32>,
    %97 = arith.subf %35, %73 : vector<8x1xf32>
    %98 = math.exp %97 : vector<8x1xf32>
    %99 = arith.mulf %98, %86 : vector<8x1xf32>
    %c0_44 = arith.constant 0 : index
    %c0_45 = arith.constant 0 : index
    %c256_46 = arith.constant 256 : index
    %100 = vector.load %arg6[%c0_44, %c0_45, %c256_46] : memref<1x8x1024xf32, #tpu.memory_space<vmem>>, vector<1x8x256xf32>
    %101 = vector.shape_cast %100 : vector<1x8x256xf32> to vector<8x256xf32>
    %102 = vector.broadcast %99 : vector<8x1xf32> to vector<8x256xf32>
    %103 = arith.mulf %101, %102 : vector<8x256xf32>
    %c0_47 = arith.constant 0 : index
    %c0_48 = arith.constant 0 : index
    %c256_49 = arith.constant 256 : index
    %104 = vector.load %arg6[%c0_47, %c0_48, %c256_49] : memref<1x8x1024xf32, #tpu.memory_space<vmem>>, vector<1x8x256xf32>
    %105 = vector.shape_cast %104 : vector<1x8x256xf32> to vector<8x256xf32>
    %106 = vector.shape_cast %103 : vector<8x256xf32> to vector<1x8x256xf32>
    tpu.vector_store %arg6[%c0_47, %c0_48, %c256_49], %106 {strides = array<i32>} : memref<1x8x1024xf32, #tpu.memory_space<vmem>>, vector<1x8x256xf32>,
    %107 = arith.subf %54, %73 : vector<8x1xf32>
    %108 = math.exp %107 : vector<8x1xf32>
    %109 = arith.mulf %108, %86 : vector<8x1xf32>
    %c0_50 = arith.constant 0 : index
    %c0_51 = arith.constant 0 : index
    %c512_52 = arith.constant 512 : index
    %110 = vector.load %arg6[%c0_50, %c0_51, %c512_52] : memref<1x8x1024xf32, #tpu.memory_space<vmem>>, vector<1x8x256xf32>
    %111 = vector.shape_cast %110 : vector<1x8x256xf32> to vector<8x256xf32>
    %112 = vector.broadcast %109 : vector<8x1xf32> to vector<8x256xf32>
    %113 = arith.mulf %111, %112 : vector<8x256xf32>
    %c0_53 = arith.constant 0 : index
    %c0_54 = arith.constant 0 : index
    %c512_55 = arith.constant 512 : index
    %114 = vector.load %arg6[%c0_53, %c0_54, %c512_55] : memref<1x8x1024xf32, #tpu.memory_space<vmem>>, vector<1x8x256xf32>
    %115 = vector.shape_cast %114 : vector<1x8x256xf32> to vector<8x256xf32>
    %116 = vector.shape_cast %113 : vector<8x256xf32> to vector<1x8x256xf32>
    tpu.vector_store %arg6[%c0_53, %c0_54, %c512_55], %116 {strides = array<i32>} : memref<1x8x1024xf32, #tpu.memory_space<vmem>>, vector<1x8x256xf32>,
    %117 = arith.subf %73, %73 : vector<8x1xf32>
    %118 = math.exp %117 : vector<8x1xf32>
    %119 = arith.mulf %118, %86 : vector<8x1xf32>
    %c0_56 = arith.constant 0 : index
    %c0_57 = arith.constant 0 : index
    %c768_58 = arith.constant 768 : index
    %120 = vector.load %arg6[%c0_56, %c0_57, %c768_58] : memref<1x8x1024xf32, #tpu.memory_space<vmem>>, vector<1x8x256xf32>
    %121 = vector.shape_cast %120 : vector<1x8x256xf32> to vector<8x256xf32>
    %122 = vector.broadcast %119 : vector<8x1xf32> to vector<8x256xf32>
    %123 = arith.mulf %121, %122 : vector<8x256xf32>
    %c0_59 = arith.constant 0 : index
    %c0_60 = arith.constant 0 : index
    %c768_61 = arith.constant 768 : index
    %124 = vector.load %arg6[%c0_59, %c0_60, %c768_61] : memref<1x8x1024xf32, #tpu.memory_space<vmem>>, vector<1x8x256xf32>
    %125 = vector.shape_cast %124 : vector<1x8x256xf32> to vector<8x256xf32>
    %126 = vector.shape_cast %123 : vector<8x256xf32> to vector<1x8x256xf32>
    tpu.vector_store %arg6[%c0_59, %c0_60, %c768_61], %126 {strides = array<i32>} : memref<1x8x1024xf32, #tpu.memory_space<vmem>>, vector<1x8x256xf32>,
    return
  }
  func.func @transform_0(%arg0: i32, %arg1: i32) -> (i32, i32, i32) {
    %c0_i32 = arith.constant 0 : i32
    %c0_i32_0 = arith.constant 0 : i32
    return %arg0, %arg1, %c0_i32 : i32, i32, i32
  }
  func.func @transform_1(%arg0: i32, %arg1: i32) -> (i32, i32, i32) {
    %c0_i32 = arith.constant 0 : i32
    %c0_i32_0 = arith.constant 0 : i32
    %c0_i32_1 = arith.constant 0 : i32
    return %arg0, %c0_i32, %c0_i32_0 : i32, i32, i32
  }
  func.func @transform_2(%arg0: i32, %arg1: i32) -> (i32, i32) {
    %c0_i32 = arith.constant 0 : i32
    %c0_i32_0 = arith.constant 0 : i32
    %c0_i32_1 = arith.constant 0 : i32
    return %c0_i32, %c0_i32_0 : i32, i32
  }
  func.func @transform_3(%arg0: i32, %arg1: i32) -> (i32, i32) {
    %c0_i32 = arith.constant 0 : i32
    %c0_i32_0 = arith.constant 0 : i32
    %c0_i32_1 = arith.constant 0 : i32
    return %c0_i32, %c0_i32_0 : i32, i32
  }
  func.func @transform_4(%arg0: i32, %arg1: i32) -> (i32, i32, i32) {
    %c0_i32 = arith.constant 0 : i32
    %c0_i32_0 = arith.constant 0 : i32
    return %arg0, %arg1, %c0_i32 : i32, i32, i32
  }
}

</mosaic_0001>

<bundles_post_ra>
// kernel: tpu_custom_call.1
= control target key start
LH: loop header
LB: loop body
LE: loop exit
PB: predicated region body
PF: predicated region fallthrough
CT: control target
= control target key end

     0   :  { %9 = vsyncpa [#allocation3], 0  ;;  %s1309_s0 = inlined_call_operand.vmem [shape: f32[2,8,4], index: 0, kind: input, shape index: {}]   ;;  %s1310_s1 = inlined_call_operand.hbm [shape: bf16[2,32,256], index: 1, kind: input, shape index: {}]   ;;  %s1311_s2 = inlined_call_operand.vmem [shape: f32[4,32], index: 2, kind: input, shape index: {}]   ;;  %s1312_s3 = inlined_call_operand.vmem [shape: f32[1,32], index: 3, kind: input, shape index: {}]   ;;  %s1313_s4 = inlined_call_operand.hbm [shape: f32[2,8,1024], index: 4, kind: output, shape index: {}]  }
   0x1   :  { %11 = vsyncpa [#allocation3 + $0x1], 0 }
   0x2   :  { %12 = vsyncpa [#allocation4], 0 }
   0x3   :  { %14 = vsyncpa [#allocation4 + $0x1], 0  ;;  %s1108_s15 = smov 0   ;;  %s1110_s16 = smov 0  }
   0x4   :  { %s1112_s17 = smov 0   ;;  %s1114_s18 = smov 0  }
   0x5   :  { %s1116_s19 = smov 0   ;;  %s1118_s20 = smov 0  }
   0x6 LB: > { %s809_s21 = sadd.s32 4294967295, %s1071_s20   ;;  %s810_s22 = sadd.s32 4294967294, %s1071_s20   ;;  %s1071_s20 = sphi %s1118_s20, %s20_s20   ;;  %s1067_s19 = sphi %s1116_s19, %s1324_s19   ;;  %s1063_s18 = sphi %s1114_s18, %s1323_s18   ;;  %s1059_s17 = sphi %s1112_s17, %s1322_s17   ;;  %s1055_s16 = sphi %s1110_s16, %s1321_s16   ;;  %s1051_s15 = sphi %s1108_s15, %s1320_s15  }
   0x7   : > { %s32_s23 = sadd.s32 1, %s1067_s19  ;;  %s67_s24 = sadd.s32 1, %s1059_s17 }
   0x8   : > { %p34_p0 = scmp.ge.s32.totalorder %s32_s23, 2  ;;  %p74_p1 = scmp.ne.s32.totalorder %s1059_s17, %s1055_s16 }
   0x9   : > { %p75_p2 = scmp.eq.s32.totalorder %s1071_s20, 0  ;;  %p80_p3 = scmp.ne.s32.totalorder %s1055_s16, %s1051_s15 }
   0xa   : > { %s1326_s23 = smov (%p34_p0, %s32_s23), 0  ;;  %p81_p5 = scmp.eq.s32.totalorder %s809_s21, 0 }
   0xb   : > { %p1149_p4 = por %p75_p2, %p74_p1  ;;  %s64_s26 = ssub.s32 %s1067_s19, %s1326_s23 }
   0xc   : > { %p148_p6 = scmp.eq.s32.totalorder %s809_s21, 1  ;;  %p65_p7 = scmp.eq.s32.totalorder %s64_s26, 0 }
   0xd   : > { %p1155_p8 = por %p81_p5, %p80_p3  ;;  %p154_p10 = scmp.eq.s32.totalorder %s810_s22, 1 }
   0xe   : > { %p1159_p9 = por %p148_p6, %p74_p1  ;;  %p865_p13 = scmp.lt.s32.totalorder %s1071_s20, 2 }
   0xf   : > { %s1164_s29 = scalar_select %p65_p7, %s1059_s17, %s67_s24  }
  0x10   : > { %p1166_p11 = por %p154_p10, %p80_p3  ;;  %s190_s5 = sand.u32 1, %s1059_s17  }
  0x11   : > { %s813_s6 = sshll.u32 %s190_s5, 5  ;;  %s844_s7 = sshll.u32 %s1067_s19, 9 }
  0x12   : > { %s200_s10 = scalar_lea.hbm %s1310_s1, %s844_s7  ;;  %s194_s11 = scalar_lea.vmem [#allocation2], %s813_s6 }
  0x13   : > { %s201_s12 = sshll.u32 %s194_s11, 4  ;;  %p1179_p0 = pnand %p865_p13, %p1149_p4  ;;  %s202_s12 = int_to_ptr.vmem [resolvable:$true] %s201_s12 }
  0x14   : > { %p816_p1 = scmp.ge.s32.totalorder %s1071_s20, 1  ;;  %s191_s14 = scalar_lea.sflag [#allocation3], %s190_s5 }
  0x15   : > { %p965_p2 = pneg %p1179_p0  ;;  %s976_s21 = scalar_lea.vmem %s202_s12, 512 }
  0x16   : > { %p977_p3 = scmp.ne.s32.totalorder %s202_s12, %s976_s21  ;;  %s1073_s22 = smov [#allocation2]  }
  0x17   : > { %s981_s24 = sshll.u32 %s1073_s22, 4  ;;  %s982_s24 = int_to_ptr.vmem [resolvable:$false] %s981_s24 }
  0x18   : > { %p979_p5 = pnand %p977_p3, %p965_p2  ;;  %s983_s26 = scalar_lea.vmem %s982_s24, 1024 }
  0x19   : > { %p984_p7 = scmp.lt.s32.totalorder %s202_s12, %s982_s24  ;;  %p985_p10 = scmp.lt.s32.totalorder %s983_s26, %s976_s21 }
  0x1a   : > { %p980_p6 = pneg %p979_p5 }
  0x1b   : > { %p986_p12 = por %p985_p10, %p984_p7 }
  0x1d   : > { %p987_p4 = pnand %p986_p12, %p980_p6 }
  0x1f   : > { %990 = shalt.err (!%p987_p4)
}
  0x20   : > { %s1074_s25 = smov 128   ;;  %s1075_s5 = smov 8  }
  0x21   : > { %860 = dma.hbm_to_vmem [thread:$0]  (!%p1179_p0), %s200_s10, 512, %s202_s12, %s191_s14, %s1074_s25, %s1074_s25, %s1075_s5  }
  0x22   : > { %p209_p13 = scmp.lt.s32.totalorder %s1071_s20, 3 }
  0x24   : > { %p210_p2 = pnand %p816_p1, %p209_p13 }
  0x25   : > { %s1192_s6 = sand.u32 (!%p210_p2), 1, %s1055_s16  }
  0x26   : > { %213 = sbr.rel (%p210_p2) target bundleno = 903 (0x387), region = 36  ;;  %s817_s7 = sshll.u32 (!%p210_p2), %s1192_s6, 5 }
  0x27   : > { %s216_s8 = scalar_lea.sflag (!%p210_p2), [#allocation3], %s1192_s6  ;;  %s219_s9 = scalar_lea.vmem (!%p210_p2), [#allocation2], %s817_s7 }
  0x2b   : > { %1042 = dma.done.wait (%p1155_p8), %s216_s8, 512  }
  0x2c   : > { %1044 = vsyncadd (%p1155_p8), %s216_s8, 4294966784  ;;  %p251_p12 = scmp.lt.s32.totalorder %s1063_s18, 1  ;;  %v1076_v0 = vmov 0.0   ;;  %vm1077_vm0 = vmmov 0   ;;  %vm272_vm1 = vcmask 1043456   ;;  %vm268_vm2 = vcmask 31744  }
  0x2d   : > { %848 = vmatprep.subr.mxu0 %v1076_v0  ;;  %850 = vmatprep.mubr.msk.f32.mxu0 %vm1077_vm0, %v1076_v0  ;;  %v260_v1 = vld [vmem:[%s1311_s2] sm:$0xf]  ;;  %v1078_v7 = vmov 0   ;;  %v423_v8 = vld [vmem:[%s219_s9 + $0x8] sm:$0xff]  ;;  %v502_v9 = vld [vmem:[%s219_s9 + $0x10] sm:$0xff]  ;;  %vm353_vm3 = vcmask 64512  }
  0x2e   : > { %s252_s10 = scalar_select %p251_p12, %s1063_s18, 1  ;;  %849 = vmatpush3.msk.msra.mxu0 %vm272_vm1, %v260_v1  ;;  %v347_v3 = vld [vmem:[%s219_s9] sm:$0xff]  ;;  %395 = vmatprep.mubr.bf16.mxu1 %v1078_v7  ;;  %v580_v10 = vld [vmem:[%s219_s9 + $0x18] sm:$0xff]  ;;  %v828_v11 = vcombine.high %v423_v8, %v423_v8  ;;  %v832_v12 = vcombine.high %v502_v9, %v502_v9  ;;  %v827_v13 = vcombine.low %v423_v8, %v423_v8 }
  0x2f   : > { %v824_v4 = vcombine.high %v347_v3, %v347_v3  ;;  %v823_v5 = vcombine.low %v347_v3, %v347_v3  ;;  %v836_v14 = vcombine.high %v580_v10, %v580_v10  ;;  %v820_v16 = vld [vmem:[%s1312_s3] ss:$0 sm:$0xff]  ;;  %v831_v18 = vcombine.low %v502_v9, %v502_v9  ;;  %s1079_s26 = smov 104   ;;  %s1080_s25 = smov 120  }
  0x30   : > { %s819_s11 = sshll.u32 %s252_s10, 3  ;;  %829 = vmatprep.subr.msk.bf16.mxu0 %vm272_vm1, %v828_v11  ;;  %v436_v15 = vsel %vm272_vm1, %v827_v13, 0  ;;  %s1081_s5 = smov 112   ;;  %v835_v23 = vcombine.low %v580_v10, %v580_v10 }
  0x31   : > { %s257_s14 = scalar_lea.vmem %s1309_s0, %s819_s11  ;;  %825 = vmatprep.subr.msk.bf16.mxu1 %vm272_vm1, %v824_v4  ;;  %v358_v6 = vsel %vm272_vm1, %v823_v5, 0  ;;  %v514_v22 = vsel %vm272_vm1, %v831_v18, 0  ;;  %s818_s7 = sshll.u32 %s1192_s6, 6 }
  0x32   : > { %v259_v2 = vld [vmem:[%s257_s14] sm:$0xff]  ;;  %378 = vmatpush1.bf16.msra.mxu1 %v358_v6  ;;  %v592_v24 = vsel %vm272_vm1, %v835_v23, 0  ;;  %s845_s8 = sshll.u32 %s1063_s18, 10  ;;  %s250_s9 = scalar_lea.vmem [#allocation5], %s818_s7 }
  0x33   : > { %851 = vmatmul.mubr.msk.f32.vlgmr.msra.gmra.mxu0 %vm268_vm2, %v259_v2  ;;  %833 = vmatprep.subr.msk.bf16.mxu1 %vm272_vm1, %v832_v12  ;;  %s713_s10 = sshll.u32 %s250_s9, 4  ;;  %s1261_s18 = scalar_lea.hbm %s1313_s4, %s845_s8  ;;  %s1263_s10 = int_to_ptr.vmem [resolvable:$true] %s713_s10 }
  0x34   : > { %473 = vmatprep.mubr.bf16.mxu0 %v1078_v7  ;;  %456 = vmatpush1.bf16.msra.mxu0 %v436_v15  ;;  %s697_s13 = scalar_lea.sflag [#allocation4], %s1192_s6  ;;  %s991_s14 = scalar_lea.vmem %s1263_s10, 1024 }
  0x35   : > { %837 = vmatprep.subr.msk.bf16.mxu0 %vm272_vm1, %v836_v14  ;;  %p992_p8 = scmp.ne.s32.totalorder %s1263_s10, %s991_s14  ;;  %s1082_s21 = smov [#allocation5]  }
  0x36   : > { %s995_s22 = sshll.u32 %s1082_s21, 4  ;;  %s996_s22 = int_to_ptr.vmem [resolvable:$false] %s995_s22 }
  0x37   : > { %p993_p0 = pnand %p992_p8, %p1159_p9  ;;  %s997_s27 = scalar_lea.vmem %s996_s22, 2048 }
  0x38   : > { %p998_p3 = scmp.lt.s32.totalorder %s1263_s10, %s996_s22  ;;  %p999_p5 = scmp.lt.s32.totalorder %s997_s27, %s991_s14 }
  0x39   : > { %p994_p1 = pneg %p993_p0 }
  0x3a   : > { %p1000_p6 = por %p999_p5, %p998_p3 }
  0x3c   : > { %p1001_p7 = pnand %p1000_p6, %p994_p1 }
  0xf3   : > { %v342_v17 = vpop.f32.mrf.mxu0 }
  0xf4   : > { %v343_v19 = vadd.f32 %v820_v16, %v342_v17 }
  0xf5   : > { %v852_v20 = vpop.f32.mrf.mxu0 }
  0xf6   : > { %v346_v21 = vpack.c.bf16 %v343_v19, %v343_v19 }
  0xf8   : > { %581 = vrot.lane.b32.xlu1 %v346_v21, %s1079_s26  ;;  %425 = vrot.lane.b32.xlu0 %v346_v21, %s1080_s25 }
  0xf9   : > { %826 = vmatmul.mubr.msk.bf16.vlgmr.msra.gmra.mxu1 %vm353_vm3, %v346_v21 }
  0xfa   : > { %534 = vmatpush1.bf16.msra.mxu1 %v514_v22  ;;  %551 = vmatprep.mubr.bf16.mxu1 %v1078_v7 }
  0xfc   : > { %503 = vrot.lane.b32.xlu0 %v346_v21, %s1081_s5 }
 0x16a   : > { %v426_v25 = vpop.permute.xlu0 %425  ;;  %v582_v27 = vpop.permute.xlu1 %581 }
 0x16b   : > { %830 = vmatmul.mubr.msk.bf16.vlgmr.msra.gmra.mxu0 %vm353_vm3, %v426_v25 }
 0x16c   : > { %612 = vmatpush1.bf16.msra.mxu0 %v592_v24  ;;  %629 = vmatprep.mubr.bf16.mxu0 %v1078_v7 }
 0x16e   : > { %v504_v26 = vpop.permute.xlu0 %503 }
 0x16f   : > { %834 = vmatmul.mubr.msk.bf16.vlgmr.msra.gmra.mxu1 %vm353_vm3, %v504_v26 }
 0x173   : > { %838 = vmatmul.mubr.msk.bf16.vlgmr.msra.gmra.mxu0 %vm353_vm3, %v582_v27 }
 0x1b9   : > { %v397_v28 = vpop.f32.mrf.mxu1 }
 0x1bb   : > { %v399_v29 = vpop.f32.mrf.mxu1 }
 0x1bc   : > { %v404_v30 = vmax.f32 %v397_v28, %v399_v29 }
 0x1bd   : > { %v401_v31 = vpop.f32.mrf.mxu1 }
 0x1be   : > { %405 = vmax.xlane.f32.xlu1 %v404_v30 }
 0x1bf   : > { %v402_v32 = vpop.f32.mrf.mxu1 }
 0x22b   : > { %v475_v33 = vpop.f32.mrf.mxu0 }
 0x22d   : > { %v477_v34 = vpop.f32.mrf.mxu0 }
 0x22e   : > { %v482_v35 = vmax.f32 %v475_v33, %v477_v34 }
 0x22f   : > { %v479_v36 = vpop.f32.mrf.mxu0  ;;  %v553_v37 = vpop.f32.mrf.mxu1 }
 0x230   : > { %483 = vmax.xlane.f32.xlu0 %v482_v35 }
 0x231   : > { %v480_v38 = vpop.f32.mrf.mxu0  ;;  %v555_v39 = vpop.f32.mrf.mxu1 }
 0x232   : > { %v560_v40 = vmax.f32 %v553_v37, %v555_v39 }
 0x233   : > { %v557_v41 = vpop.f32.mrf.mxu1  ;;  %v631_v42 = vpop.f32.mrf.mxu0 }
 0x234   : > { %561 = vmax.xlane.f32.xlu0 %v560_v40 }
 0x235   : > { %v558_v43 = vpop.f32.mrf.mxu1  ;;  %v633_v44 = vpop.f32.mrf.mxu0 }
 0x236   : > { %v638_v45 = vmax.f32 %v631_v42, %v633_v44 }
 0x237   : > { %v635_v46 = vpop.f32.mrf.mxu0 }
 0x238   : > { %639 = vmax.xlane.f32.xlu1 %v638_v45 }
 0x239   : > { %v636_v47 = vpop.f32.mrf.mxu0 }
 0x247   : > { %v1224_v48 = vpop.xlane.xlu1 %405 }
 0x248   : > { %v407_v49 = vsub.f32 %v397_v28, %v1224_v48  ;;  %v408_v50 = vsub.f32 %v399_v29, %v1224_v48  ;;  %v415_v22 = vsub.f32 -inf, %v1224_v48 }
 0x24a   : > { %v409_v51 = vmul.f32 1.442695, %v407_v49  ;;  %v411_v52 = vmul.f32 1.442695, %v408_v50  ;;  %v416_v23 = vmul.f32 1.442695, %v415_v22 }
 0x24c   : > { %931 = vpow2.f32 %v409_v51 }
 0x24d   : > { %933 = vpow2.f32 %v411_v52 }
 0x259   : > { %v1228_v53 = vpop.eup %931 }
 0x25a   : > { %v1230_v54 = vpop.eup %933 }
 0x25b   : > { %v419_v55 = vadd.f32 %v1230_v54, %v1228_v53 }
 0x25d   : > { %420 = vadd.xlane.f32.xlu0 %v419_v55 }
 0x2b9   : > { %v484_v56 = vpop.xlane.xlu0 %483 }
 0x2ba   : > { %v1235_v57 = vmax.f32 %v1224_v48, %v484_v56 }
 0x2bc   : > { %v486_v58 = vsub.f32 %v475_v33, %v1235_v57  ;;  %v487_v59 = vsub.f32 %v477_v34, %v1235_v57  ;;  %v494_v24 = vsub.f32 %v1224_v48, %v1235_v57 }
 0x2bd   : > { %v562_v60 = vpop.xlane.xlu0 %561 }
 0x2be   : > { %v563_v61 = vmax.f32 %v1235_v57, %v562_v60  ;;  %v488_v62 = vmul.f32 1.442695, %v486_v58  ;;  %v490_v63 = vmul.f32 1.442695, %v487_v59  ;;  %v495_v25 = vmul.f32 1.442695, %v494_v24 }
 0x2c0   : > { %v564_v0 = vsub.f32 %v553_v37, %v563_v61  ;;  %v565_v1 = vsub.f32 %v555_v39, %v563_v61  ;;  %v572_v2 = vsub.f32 %v1235_v57, %v563_v61  ;;  %935 = vpow2.f32 %v488_v62 }
 0x2c1   : > { %v640_v3 = vpop.xlane.xlu1 %639  ;;  %937 = vpow2.f32 %v490_v63 }
 0x2c2   : > { %v566_v4 = vmul.f32 1.442695, %v564_v0  ;;  %v568_v5 = vmul.f32 1.442695, %v565_v1  ;;  %v641_v6 = vmax.f32 %v563_v61, %v640_v3  ;;  %v573_v26 = vmul.f32 1.442695, %v572_v2 }
 0x2c4   : > { %939 = vpow2.f32 %v566_v4  ;;  %v669_v7 = vsub.f32 %v1235_v57, %v641_v6  ;;  %v642_v8 = vsub.f32 %v631_v42, %v641_v6  ;;  %v643_v9 = vsub.f32 %v633_v44, %v641_v6 }
 0x2c5   : > { %941 = vpow2.f32 %v568_v5  ;;  %v650_v10 = vsub.f32 %v563_v61, %v641_v6  ;;  %v659_v37 = vsub.f32 %v1224_v48, %v641_v6  ;;  %v686_v40 = vsub.f32 %v641_v6, %v641_v6 }
 0x2c6   : > { %v644_v11 = vmul.f32 1.442695, %v642_v8  ;;  %v646_v12 = vmul.f32 1.442695, %v643_v9  ;;  %v670_v45 = vmul.f32 1.442695, %v669_v7 }
 0x2c7   : > { %v651_v27 = vmul.f32 1.442695, %v650_v10  ;;  %v660_v43 = vmul.f32 1.442695, %v659_v37  ;;  %v687_v46 = vmul.f32 1.442695, %v686_v40 }
 0x2c8   : > { %943 = vpow2.f32 %v644_v11 }
 0x2c9   : > { %945 = vpow2.f32 %v646_v12 }
 0x2ca   : > { %947 = vpow2.f32 %v416_v23 }
 0x2cb   : > { %949 = vpow2.f32 %v495_v25 }
 0x2cc   : > { %951 = vpow2.f32 %v573_v26 }
 0x2cd   : > { %v1242_v13 = vpop.eup %935  ;;  %953 = vpow2.f32 %v651_v27 }
 0x2ce   : > { %v1244_v14 = vpop.eup %937  ;;  %955 = vpow2.f32 %v660_v43 }
 0x2cf   : > { %v498_v15 = vadd.f32 %v1244_v14, %v1242_v13  ;;  %957 = vpow2.f32 %v670_v45 }
 0x2d0   : > { %959 = vpow2.f32 %v687_v46 }
 0x2d1   : > { %v940_v16 = vpop.eup %939  ;;  %499 = vadd.xlane.f32.xlu1 %v498_v15 }
 0x2d2   : > { %v942_v17 = vpop.eup %941 }
 0x2d3   : > { %v576_v18 = vadd.f32 %v942_v17, %v940_v16 }
 0x2d5   : > { %577 = vadd.xlane.f32.xlu0 %v576_v18  ;;  %v944_v19 = vpop.eup %943 }
 0x2d6   : > { %v946_v20 = vpop.eup %945 }
 0x2d7   : > { %v654_v21 = vadd.f32 %v946_v20, %v944_v19  ;;  %v948_v28 = vpop.eup %947 }
 0x2d8   : > { %v418_v30 = vmul.f32 0.0, %v948_v28  ;;  %v950_v32 = vpop.eup %949 }
 0x2d9   : > { %655 = vadd.xlane.f32.xlu1 %v654_v21  ;;  %v952_v36 = vpop.eup %951 }
 0x2da   : > { %v954_v42 = vpop.eup %953 }
 0x2db   : > { %v956_v50 = vpop.eup %955 }
 0x2dc   : > { %v958_v48 = vpop.eup %957 }
 0x2dd   : > { %v960_v51 = vpop.eup %959 }
 0x2e6   : > { %v421_v29 = vpop.xlane.xlu0 %420 }
 0x2e7   : > { %v422_v31 = vadd.f32 %v421_v29, %v418_v30 }
 0x2e9   : > { %v497_v33 = vmul.f32 %v950_v32, %v422_v31 }
 0x35a   : > { %v500_v34 = vpop.xlane.xlu1 %499 }
 0x35b   : > { %v501_v35 = vadd.f32 %v500_v34, %v497_v33 }
 0x35d   : > { %v575_v38 = vmul.f32 %v952_v36, %v501_v35 }
 0x35e   : > { %v578_v39 = vpop.xlane.xlu0 %577 }
 0x35f   : > { %v579_v41 = vadd.f32 %v578_v39, %v575_v38 }
 0x361   : > { %v653_v44 = vmul.f32 %v954_v42, %v579_v41 }
 0x362   : > { %v656_v47 = vpop.xlane.xlu1 %655 }
 0x363   : > { %v657_v49 = vadd.f32 %v656_v47, %v653_v44 }
 0x365   : > { %961 = vrcp.f32 %v657_v49 }
 0x372   : > { %v962_v52 = vpop.eup %961 }
 0x373   : > { %v679_v55 = vmul.f32 %v962_v52, %v954_v42  ;;  %v662_v56 = vmul.f32 %v962_v52, %v956_v50  ;;  %v672_v57 = vmul.f32 %v962_v52, %v958_v48  ;;  %v689_v58 = vmul.f32 %v962_v52, %v960_v51 }
 0x375   : > { %v682_v59 = vmul.f32 %v940_v16, %v679_v55  ;;  %v683_v60 = vmul.f32 %v942_v17, %v679_v55  ;;  %v665_v61 = vmul.f32 %v1228_v53, %v662_v56  ;;  %v666_v62 = vmul.f32 %v1230_v54, %v662_v56 }
 0x376   : > { %v675_v63 = vmul.f32 %v1242_v13, %v672_v57  ;;  %v676_v0 = vmul.f32 %v1244_v14, %v672_v57  ;;  %v692_v1 = vmul.f32 %v944_v19, %v689_v58  ;;  %v693_v2 = vmul.f32 %v946_v20, %v689_v58 }
 0x377   : > { %684 = vst [vmem:[%s250_s9 + $0x20] sm:$0xff] %v682_v59  ;;  %685 = vst [vmem:[%s250_s9 + $0x28] sm:$0xff] %v683_v60 }
 0x378   : > { %667 = vst [vmem:[%s250_s9] sm:$0xff] %v665_v61  ;;  %668 = vst [vmem:[%s250_s9 + $0x8] sm:$0xff] %v666_v62 }
 0x379   : > { %677 = vst [vmem:[%s250_s9 + $0x10] sm:$0xff] %v675_v63  ;;  %678 = vst [vmem:[%s250_s9 + $0x18] sm:$0xff] %v676_v0 }
 0x37a   : > { %694 = vst [vmem:[%s250_s9 + $0x30] sm:$0xff] %v692_v1  ;;  %695 = vst [vmem:[%s250_s9 + $0x38] sm:$0xff] %v693_v2 }
 0x37b   : > { %1004 = shalt.err (!%p1001_p7)
}
 0x37c   : > { %s1005_s24 = scalar_lea.hbm %s1261_s18, 1024  ;;  %s1009_s25 = scalar_lea.hbm %s1313_s4, 2048 }
 0x37d   : > { %p1006_p10 = scmp.ne.s32.totalorder %s1261_s18, %s1005_s24  ;;  %p1010_p2 = scmp.lt.s32.totalorder %s1261_s18, %s1313_s4 }
 0x37e   : > { %p1011_p12 = scmp.lt.s32.totalorder %s1009_s25, %s1005_s24 }
 0x37f   : > { %p1007_p4 = pnand %p1006_p10, %p1159_p9 }
 0x380   : > { %p1012_p8 = por %p1011_p12, %p1010_p2 }
 0x381   : > { %p1008_p13 = pneg %p1007_p4 }
 0x383   : > { %p1013_p0 = pnand %p1012_p8, %p1008_p13 }
 0x385   : > { %1016 = shalt.err (!%p1013_p0)
}
 0x386   : > { %855 = dma.vmem_to_hbm [thread:$0]  (%p1159_p9), %s1263_s10, 1024, %s1261_s18, %s697_s13  }
 0x387 PF: > { %s725_s8 = sand.u32 1, %s1051_s15   ;;  %p1319_p1 = scmp.ge.s32.totalorder %s1071_s20, 2 }
 0x388   : > { %s726_s9 = scalar_lea.sflag [#allocation4], %s725_s8 }
 0x389   : > { %p862_p3 = pnand %p1319_p1, %p1166_p11 }
 0x38b   : > { %p863_p5 = pneg %p862_p3 }
 0x38d   : > { %1046 = dma.done.wait (%p863_p5), %s726_s9, 1024  }
 0x38e   : > { %1048 = vsyncadd (%p863_p5), %s726_s9, 4294966272  ;;  %s20_s20 = sadd.s32 1, %s1071_s20   ;;  %s1320_s15 = smov %s1055_s16 }
 0x38f   : > { %p17_p6 = scmp.ge.s32.totalorder %s20_s20, 4   ;;  %s1321_s16 = smov %s1059_s17 }
 0x390   : > { %s1322_s17 = smov %s1164_s29  ;;  %s1323_s18 = smov %s1067_s19 }
 0x391   : > { %s1324_s19 = smov %s1326_s23  ;;  %19 = sbr.rel (!%p17_p6) target bundleno = 6 (0x6), region = 84 }
 0x396   :  { %731 = vsyncpa [#allocation3], 1 }
 0x397   :  { %733 = vsyncpa [#allocation3 + $0x1], 1 }
 0x398   :  { %734 = vsyncpa [#allocation4], 1 }
 0x399   :  { %736 = vsyncpa [#allocation4 + $0x1], 1 }

</bundles_post_ra>
